<compile_context>
chip_gen: v5e
topology: v5e:2x2
jax: 0.10.0
libtpu: 0.0.40
codegen_flags: <defaults>
</compile_context>

<pallas_src>
import jax
import jax.numpy as jnp
from jax.experimental import pallas as pl
from jax.experimental.pallas import tpu as pltpu

NEG_SLOPE = 0.01  # nn.LeakyReLU() default


def _lrelu(v):
    # 2 VALU ops (mul + max); identical to where(v>0, v, a*v) for 0<a<1.
    return jnp.maximum(v, NEG_SLOPE * v)


# --------------------------------------------------------------------------
# Kernel: one batch tile (block_b samples, both W columns on lanes) per step.
# Activations are (features, lanes) tiles; lanes = 2 * block_b.
# --------------------------------------------------------------------------
def conv_nn_pose_kernel(x_ref, wf0_ref, wf1_ref, wb_ref, bb_ref,
                        fw1_ref, fb1_ref, fw2_ref, fb2_ref, out_ref):
    n2 = x_ref.shape[-1]          # 2 * block_b (both W columns on the lane axis)
    bt = n2 // 2                  # block_b (multiple of 128)

    x = x_ref[...]                                       # (17, 2Bt) bf16; row 16 == 1.0 (bias)

    # Stage 1: conv1∘conv2 (pre-composed, bias folded into column 16) as two
    # M=96 GEMMs (even/odd H rows), running max == maxpool1 (2,1), then
    # LeakyReLU (monotone, commutes with the max).
    h = jnp.dot(wf0_ref[...], x, preferred_element_type=jnp.float32)
    h = jnp.maximum(h, jnp.dot(wf1_ref[...], x,
                               preferred_element_type=jnp.float32))
    h = _lrelu(h)                                        # (96, 2Bt) f32, rows = hp*16 + c

    # Stage 2: conv3∘conv4 (pre-composed).  Output rows = h'*32 + c'.
    h = jnp.dot(wb_ref[...], h.astype(jnp.bfloat16),
                preferred_element_type=jnp.float32)      # (64, 2Bt)
    # maxpool2 (2,2): W (lane-half) max first — bias is lane-constant so it
    # commutes — then the bias add on the halved tile, then the H (sublane-
    # half) max, then LeakyReLU on the fully pooled (32, Bt) tile only.
    h = jnp.maximum(h[:, :bt], h[:, bt:])                # (64, Bt)
    h = h + bb_ref[...]
    feat = _lrelu(jnp.maximum(h[:32, :], h[32:, :]))     # (32, Bt)

    # fc1 -> relu5 -> fc2   (weights kept in PyTorch (out,in) layout).
    z = jnp.dot(fw1_ref[...], feat.astype(jnp.bfloat16),
                preferred_element_type=jnp.float32)
    z = _lrelu(z + fb1_ref[...])                         # (24, Bt)
    z = jnp.dot(fw2_ref[...], z.astype(jnp.bfloat16),
                preferred_element_type=jnp.float32)
    out_ref[...] = z + fb2_ref[...]                      # (20, Bt)


# --------------------------------------------------------------------------
# Host-side weight composition (exact in f32; final cast to bf16).
# --------------------------------------------------------------------------
def _conv_to_matrix(w, h_in):
    """Dense matrix of a 'VALID' (K,1) conv on one W column.

    w: PyTorch layout (Cout, Cin, K, 1).
    Returns (H_out*Cout, H_in*Cin); row = h_out*Cout + c_out,
    input index = h_in*Cin + c_in.
    """
    cout, cin, k, _ = w.shape
    h_out = h_in - k + 1
    f_in = h_in * cin
    basis = jnp.eye(f_in, dtype=jnp.float32).reshape(f_in, h_in, cin)
    basis = jnp.transpose(basis, (0, 2, 1))[:, :, :, None]           # NCHW, W=1
    out = jax.lax.conv_general_dilated(
        basis, w, (1, 1), 'VALID',
        dimension_numbers=('NCHW', 'OIHW', 'NCHW'))                  # (F_in, Cout, H_out, 1)
    out = jnp.transpose(out[:, :, :, 0], (2, 1, 0))                  # (H_out, Cout, F_in)
    return out.reshape(h_out * cout, f_in)


def _reorder_front(a):
    """Reorder rows from (h=2*hp+s, c) to (s, hp, c): the two parity halves of
    maxpool1 become the top/bottom 96-row halves."""
    rest = a.shape[1:]
    a = a.reshape(6, 2, 16, *rest)                                   # (hp, s, c, ...)
    a = jnp.transpose(a, (1, 0, 2) + tuple(range(3, a.ndim)))        # (s, hp, c, ...)
    return a.reshape(192, *rest)


# --------------------------------------------------------------------------
# Wrapper
# --------------------------------------------------------------------------
def conv_nn_pose_forward(x_nchw, p, block_b=2048):
    """x_nchw: (B, 1, 16, 2) float32 -> (B, 20) float32."""
    B = x_nchw.shape[0]
    # Keep the batch tile a multiple of 128; prefer >=2 grid steps whenever
    # B > 128 so both v7x TensorCores get work on the "parallel" axis, but cap
    # the tile at block_b so grid overhead stays amortized for large B.
    bt = min(block_b, max(128, 128 * pl.cdiv(B, 256)))
    g = pl.cdiv(B, bt)
    bpad = g * bt

    # ---- compose conv1∘conv2 and conv3∘conv4 (no nonlinearity in between) ----
    m1 = _conv_to_matrix(p['w1'], 16)                                # (224, 16)
    m2 = _conv_to_matrix(p['w2'], 14)                                # (192, 224)
    wf = m2 @ m1                                                     # (192, 16)
    bf = m2 @ jnp.tile(p['b1'], 14) + jnp.tile(p['b2'], 12)          # (192,)
    wf_aug = jnp.concatenate([wf, bf[:, None]], axis=1)              # (192, 17) bias folded
    wf_aug = _reorder_front(wf_aug)                                  # halves = H parities
    wf0 = wf_aug[:96].astype(jnp.bfloat16)                           # (96, 17) even H rows
    wf1 = wf_aug[96:].astype(jnp.bfloat16)                           # (96, 17) odd  H rows

    m3 = _conv_to_matrix(p['w3'], 6)                                 # (128, 96)
    m4 = _conv_to_matrix(p['w4'], 4)                                 # (64, 128)
    wb = (m4 @ m3).astype(jnp.bfloat16)                              # (64, 96)
    bb = (m4 @ jnp.tile(p['b3'], 4) + jnp.tile(p['b4'], 2))          # (64,) f32

    fw1 = p['fc1_w'].astype(jnp.bfloat16)                            # (24, 32)
    fw2 = p['fc2_w'].astype(jnp.bfloat16)                            # (20, 24)

    # ---- input layout: (17, G*2*Bt), lane = g*2*Bt + w*Bt + i, row16 = 1 ----
    x = x_nchw[:, 0, :, :]                                           # (B, 16, 2)
    if bpad != B:
        x = jnp.pad(x, ((0, bpad - B), (0, 0), (0, 0)))
    x = x.reshape(g, bt, 16, 2)
    x = jnp.transpose(x, (2, 0, 3, 1)).reshape(16, g * 2 * bt)
    x = jnp.concatenate([x, jnp.ones((1, g * 2 * bt), jnp.float32)], axis=0)
    x = x.astype(jnp.bfloat16)                                       # (17, G*2*Bt)

    args = (
        x,
        wf0, wf1,
        wb, bb.reshape(64, 1),
        fw1, p['fc1_b'].reshape(24, 1),
        fw2, p['fc2_b'].reshape(20, 1),
    )

    def const(shape):
        return pl.BlockSpec(shape, lambda i: (0,) * len(shape))

    flops = bpad * (2 * 2 * (2 * 96 * 17) + 2 * (2 * 64 * 96)
                    + 2 * 24 * 32 + 2 * 20 * 24)
    bytes_accessed = (bpad * (2 * 17 * 2 + 20 * 4)
                      + 2 * (2 * 96 * 17 + 64 * 96 + 24 * 32 + 20 * 24)
                      + 4 * (64 + 24 + 20))

    cp_kwargs = dict(dimension_semantics=("parallel",))
    if bt >= 2048:
        # v5e's default scoped-VMEM limit (16 MiB) is the binding one at large
        # tiles; actual per-step usage is still only a few MiB on every gen.
        cp_kwargs["vmem_limit_bytes"] = 64 << 20

    out = pl.pallas_call(
        conv_nn_pose_kernel,
        out_shape=jax.ShapeDtypeStruct((20, bpad), jnp.float32),
        grid=(g,),
        in_specs=[
            pl.BlockSpec((17, 2 * bt), lambda i: (0, i)),
            const((96, 17)), const((96, 17)),
            const((64, 96)), const((64, 1)),
            const((24, 32)), const((24, 1)),
            const((20, 24)), const((20, 1)),
        ],
        out_specs=pl.BlockSpec((20, bt), lambda i: (0, i)),
        compiler_params=pltpu.CompilerParams(**cp_kwargs),
        cost_estimate=pl.CostEstimate(
            flops=flops, transcendentals=0, bytes_accessed=bytes_accessed),
    )(*args)

    return out.T[:B]                                                 # (B, 20)


# --------------------------------------------------------------------------
# Params + pure-JAX reference (mirrors the PyTorch forward exactly, f32)
# --------------------------------------------------------------------------
def init_params(key):
    ks = jax.random.split(key, 12)
    n = lambda k, s: 0.1 * jax.random.normal(k, s, jnp.float32)
    return dict(
        w1=n(ks[0], (16, 1, 3, 1)),  b1=n(ks[1], (16,)),
        w2=n(ks[2], (16, 16, 3, 1)), b2=n(ks[3], (16,)),
        w3=n(ks[4], (32, 16, 3, 1)), b3=n(ks[5], (32,)),
        w4=n(ks[6], (32, 32, 3, 1)), b4=n(ks[7], (32,)),
        fc1_w=n(ks[8], (24, 32)),    fc1_b=n(ks[9], (24,)),
        fc2_w=n(ks[10], (20, 24)),   fc2_b=n(ks[11], (20,)),
    )


def reference_forward(x, p):
    def conv(h, w, b):
        o = jax.lax.conv_general_dilated(
            h, w, (1, 1), 'VALID',
            dimension_numbers=('NCHW', 'OIHW', 'NCHW'))
        return o + b[None, :, None, None]
    lr = lambda v: jnp.where(v > 0, v, NEG_SLOPE * v)

    h = conv(x, p['w1'], p['b1'])
    h = conv(h, p['w2'], p['b2'])
    h = lr(h)                                                        # relu2
    h = jnp.maximum(h[:, :, 0::2, :], h[:, :, 1::2, :])              # maxpool (2,1)
    h = conv(h, p['w3'], p['b3'])
    h = conv(h, p['w4'], p['b4'])
    h = lr(h)                                                        # relu4
    h = jnp.maximum(jnp.maximum(h[:, :, 0::2, 0::2], h[:, :, 0::2, 1::2]),
                    jnp.maximum(h[:, :, 1::2, 0::2], h[:, :, 1::2, 1::2]))
    h = h.reshape(h.shape[0], -1)                                    # (B, 32)
    h = lr(h @ p['fc1_w'].T + p['fc1_b'])                            # relu5
    return h @ p['fc2_w'].T + p['fc2_b']


if __name__ == "__main__":
    key = jax.random.PRNGKey(0)
    kx, kp = jax.random.split(key)
    B = 4
    x = jax.random.normal(kx, (B, 1, 16, 2), jnp.float32)            # NCHW
    params = init_params(kp)

    out = jax.block_until_ready(conv_nn_pose_forward(x, params))
    ref = jax.block_until_ready(reference_forward(x, params))

    assert out.shape == (B, 20)
    # bf16 MXU operands (f32 accumulation) => loosened tolerance vs f32 ref.
    assert jnp.allclose(out, ref, rtol=2e-2, atol=2e-2), (out, ref)
    print("KERNEL_OK")
</pallas_src>

<mosaic_0001>
module attributes {stable_mosaic.version = 11 : i64} {
  func.func @conv_nn_pose_kernel(%arg0: i32, %arg1: memref<17x256xbf16, #tpu.memory_space<vmem>>, %arg2: memref<96x17xbf16, #tpu.memory_space<vmem>>, %arg3: memref<96x17xbf16, #tpu.memory_space<vmem>>, %arg4: memref<64x96xbf16, #tpu.memory_space<vmem>>, %arg5: memref<64x1xf32, #tpu.memory_space<vmem>>, %arg6: memref<24x32xbf16, #tpu.memory_space<vmem>>, %arg7: memref<24x1xf32, #tpu.memory_space<vmem>>, %arg8: memref<20x24xbf16, #tpu.memory_space<vmem>>, %arg9: memref<20x1xf32, #tpu.memory_space<vmem>>, %arg10: memref<20x128xf32, #tpu.memory_space<vmem>>) attributes {dimension_semantics = [#tpu.dimension_semantics<parallel>], iteration_bounds = array<i64: 1>, scalar_prefetch = 0 : i64, scratch_operands = 0 : i64, tpu.core_type = #tpu.core_type<tc>, window_params = [{transform_indices = @transform_0, window_bounds = array<i64: 17, 256>}, {pipeline_mode = #tpu.pipeline_mode<synchronous>, transform_indices = @transform_1, window_bounds = array<i64: 96, 17>}, {pipeline_mode = #tpu.pipeline_mode<synchronous>, transform_indices = @transform_2, window_bounds = array<i64: 96, 17>}, {pipeline_mode = #tpu.pipeline_mode<synchronous>, transform_indices = @transform_3, window_bounds = array<i64: 64, 96>}, {pipeline_mode = #tpu.pipeline_mode<synchronous>, transform_indices = @transform_4, window_bounds = array<i64: 64, 1>}, {pipeline_mode = #tpu.pipeline_mode<synchronous>, transform_indices = @transform_5, window_bounds = array<i64: 24, 32>}, {pipeline_mode = #tpu.pipeline_mode<synchronous>, transform_indices = @transform_6, window_bounds = array<i64: 24, 1>}, {pipeline_mode = #tpu.pipeline_mode<synchronous>, transform_indices = @transform_7, window_bounds = array<i64: 20, 24>}, {pipeline_mode = #tpu.pipeline_mode<synchronous>, transform_indices = @transform_8, window_bounds = array<i64: 20, 1>}, {transform_indices = @transform_9, window_bounds = array<i64: 20, 128>}]} {
    %c0 = arith.constant 0 : index
    %c0_0 = arith.constant 0 : index
    %0 = vector.load %arg1[%c0, %c0_0] : memref<17x256xbf16, #tpu.memory_space<vmem>>, vector<17x256xbf16>
    %c0_1 = arith.constant 0 : index
    %c0_2 = arith.constant 0 : index
    %1 = vector.load %arg2[%c0_1, %c0_2] : memref<96x17xbf16, #tpu.memory_space<vmem>>, vector<96x17xbf16>
    %cst = arith.constant dense<0.000000e+00> : vector<96x256xf32>
    %2 = tpu.matmul %1, %0, %cst {dimension_numbers = #tpu.dot_dimension_numbers<[1], [0], [0], [1], [0, 0, 1, 1], [], []>} : vector<96x17xbf16>, vector<17x256xbf16>, vector<96x256xf32> -> vector<96x256xf32>
    %c0_3 = arith.constant 0 : index
    %c0_4 = arith.constant 0 : index
    %3 = vector.load %arg3[%c0_3, %c0_4] : memref<96x17xbf16, #tpu.memory_space<vmem>>, vector<96x17xbf16>
    %cst_5 = arith.constant dense<0.000000e+00> : vector<96x256xf32>
    %4 = tpu.matmul %3, %0, %cst_5 {dimension_numbers = #tpu.dot_dimension_numbers<[1], [0], [0], [1], [0, 0, 1, 1], [], []>} : vector<96x17xbf16>, vector<17x256xbf16>, vector<96x256xf32> -> vector<96x256xf32>
    %5 = arith.maximumf %2, %4 : vector<96x256xf32>
    %cst_6 = arith.constant 0.00999999977 : f32
    %6 = vector.broadcast %cst_6 : f32 to vector<96x256xf32>
    %7 = arith.mulf %6, %5 : vector<96x256xf32>
    %8 = arith.maximumf %5, %7 : vector<96x256xf32>
    %c0_7 = arith.constant 0 : index
    %c0_8 = arith.constant 0 : index
    %9 = vector.load %arg4[%c0_7, %c0_8] : memref<64x96xbf16, #tpu.memory_space<vmem>>, vector<64x96xbf16>
    %10 = arith.truncf %8 : vector<96x256xf32> to vector<96x256xbf16>
    %cst_9 = arith.constant dense<0.000000e+00> : vector<64x256xf32>
    %11 = tpu.matmul %9, %10, %cst_9 {dimension_numbers = #tpu.dot_dimension_numbers<[1], [0], [0], [1], [0, 0, 1, 1], [], []>} : vector<64x96xbf16>, vector<96x256xbf16>, vector<64x256xf32> -> vector<64x256xf32>
    %12 = vector.extract_strided_slice %11 {offsets = [0, 0], sizes = [64, 128], strides = [1, 1]} : vector<64x256xf32> to vector<64x128xf32>
    %13 = vector.extract_strided_slice %11 {offsets = [0, 128], sizes = [64, 128], strides = [1, 1]} : vector<64x256xf32> to vector<64x128xf32>
    %14 = arith.maximumf %12, %13 : vector<64x128xf32>
    %c0_10 = arith.constant 0 : index
    %c0_11 = arith.constant 0 : index
    %15 = vector.load %arg5[%c0_10, %c0_11] : memref<64x1xf32, #tpu.memory_space<vmem>>, vector<64x1xf32>
    %16 = vector.broadcast %15 : vector<64x1xf32> to vector<64x128xf32>
    %17 = arith.addf %14, %16 : vector<64x128xf32>
    %18 = vector.extract_strided_slice %17 {offsets = [0, 0], sizes = [32, 128], strides = [1, 1]} : vector<64x128xf32> to vector<32x128xf32>
    %19 = vector.extract_strided_slice %17 {offsets = [32, 0], sizes = [32, 128], strides = [1, 1]} : vector<64x128xf32> to vector<32x128xf32>
    %20 = arith.maximumf %18, %19 : vector<32x128xf32>
    %cst_12 = arith.constant 0.00999999977 : f32
    %21 = vector.broadcast %cst_12 : f32 to vector<32x128xf32>
    %22 = arith.mulf %21, %20 : vector<32x128xf32>
    %23 = arith.maximumf %20, %22 : vector<32x128xf32>
    %c0_13 = arith.constant 0 : index
    %c0_14 = arith.constant 0 : index
    %24 = vector.load %arg6[%c0_13, %c0_14] : memref<24x32xbf16, #tpu.memory_space<vmem>>, vector<24x32xbf16>
    %25 = arith.truncf %23 : vector<32x128xf32> to vector<32x128xbf16>
    %cst_15 = arith.constant dense<0.000000e+00> : vector<24x128xf32>
    %26 = tpu.matmul %24, %25, %cst_15 {dimension_numbers = #tpu.dot_dimension_numbers<[1], [0], [0], [1], [0, 0, 1, 1], [], []>} : vector<24x32xbf16>, vector<32x128xbf16>, vector<24x128xf32> -> vector<24x128xf32>
    %c0_16 = arith.constant 0 : index
    %c0_17 = arith.constant 0 : index
    %27 = vector.load %arg7[%c0_16, %c0_17] : memref<24x1xf32, #tpu.memory_space<vmem>>, vector<24x1xf32>
    %28 = vector.broadcast %27 : vector<24x1xf32> to vector<24x128xf32>
    %29 = arith.addf %26, %28 : vector<24x128xf32>
    %cst_18 = arith.constant 0.00999999977 : f32
    %30 = vector.broadcast %cst_18 : f32 to vector<24x128xf32>
    %31 = arith.mulf %30, %29 : vector<24x128xf32>
    %32 = arith.maximumf %29, %31 : vector<24x128xf32>
    %c0_19 = arith.constant 0 : index
    %c0_20 = arith.constant 0 : index
    %33 = vector.load %arg8[%c0_19, %c0_20] : memref<20x24xbf16, #tpu.memory_space<vmem>>, vector<20x24xbf16>
    %34 = arith.truncf %32 : vector<24x128xf32> to vector<24x128xbf16>
    %cst_21 = arith.constant dense<0.000000e+00> : vector<20x128xf32>
    %35 = tpu.matmul %33, %34, %cst_21 {dimension_numbers = #tpu.dot_dimension_numbers<[1], [0], [0], [1], [0, 0, 1, 1], [], []>} : vector<20x24xbf16>, vector<24x128xbf16>, vector<20x128xf32> -> vector<20x128xf32>
    %c0_22 = arith.constant 0 : index
    %c0_23 = arith.constant 0 : index
    %36 = vector.load %arg9[%c0_22, %c0_23] : memref<20x1xf32, #tpu.memory_space<vmem>>, vector<20x1xf32>
    %37 = vector.broadcast %36 : vector<20x1xf32> to vector<20x128xf32>
    %38 = arith.addf %35, %37 : vector<20x128xf32>
    %c0_24 = arith.constant 0 : index
    %c0_25 = arith.constant 0 : index
    %39 = vector.load %arg10[%c0_24, %c0_25] : memref<20x128xf32, #tpu.memory_space<vmem>>, vector<20x128xf32>
    tpu.vector_store %arg10[%c0_24, %c0_25], %38 {strides = array<i32>} : memref<20x128xf32, #tpu.memory_space<vmem>>, vector<20x128xf32>,
    return
  }
  func.func @transform_0(%arg0: i32) -> (i32, i32) {
    %c0_i32 = arith.constant 0 : i32
    %c0_i32_0 = arith.constant 0 : i32
    return %c0_i32, %arg0 : i32, i32
  }
  func.func @transform_1(%arg0: i32) -> (i32, i32) {
    %c0_i32 = arith.constant 0 : i32
    %c0_i32_0 = arith.constant 0 : i32
    %c0_i32_1 = arith.constant 0 : i32
    return %c0_i32, %c0_i32_0 : i32, i32
  }
  func.func @transform_2(%arg0: i32) -> (i32, i32) {
    %c0_i32 = arith.constant 0 : i32
    %c0_i32_0 = arith.constant 0 : i32
    %c0_i32_1 = arith.constant 0 : i32
    return %c0_i32, %c0_i32_0 : i32, i32
  }
  func.func @transform_3(%arg0: i32) -> (i32, i32) {
    %c0_i32 = arith.constant 0 : i32
    %c0_i32_0 = arith.constant 0 : i32
    %c0_i32_1 = arith.constant 0 : i32
    return %c0_i32, %c0_i32_0 : i32, i32
  }
  func.func @transform_4(%arg0: i32) -> (i32, i32) {
    %c0_i32 = arith.constant 0 : i32
    %c0_i32_0 = arith.constant 0 : i32
    %c0_i32_1 = arith.constant 0 : i32
    return %c0_i32, %c0_i32_0 : i32, i32
  }
  func.func @transform_5(%arg0: i32) -> (i32, i32) {
    %c0_i32 = arith.constant 0 : i32
    %c0_i32_0 = arith.constant 0 : i32
    %c0_i32_1 = arith.constant 0 : i32
    return %c0_i32, %c0_i32_0 : i32, i32
  }
  func.func @transform_6(%arg0: i32) -> (i32, i32) {
    %c0_i32 = arith.constant 0 : i32
    %c0_i32_0 = arith.constant 0 : i32
    %c0_i32_1 = arith.constant 0 : i32
    return %c0_i32, %c0_i32_0 : i32, i32
  }
  func.func @transform_7(%arg0: i32) -> (i32, i32) {
    %c0_i32 = arith.constant 0 : i32
    %c0_i32_0 = arith.constant 0 : i32
    %c0_i32_1 = arith.constant 0 : i32
    return %c0_i32, %c0_i32_0 : i32, i32
  }
  func.func @transform_8(%arg0: i32) -> (i32, i32) {
    %c0_i32 = arith.constant 0 : i32
    %c0_i32_0 = arith.constant 0 : i32
    %c0_i32_1 = arith.constant 0 : i32
    return %c0_i32, %c0_i32_0 : i32, i32
  }
  func.func @transform_9(%arg0: i32) -> (i32, i32) {
    %c0_i32 = arith.constant 0 : i32
    %c0_i32_0 = arith.constant 0 : i32
    return %c0_i32, %arg0 : i32, i32
  }
}

</mosaic_0001>

<bundles_post_ra>
// kernel: tpu_custom_call.1
= control target key start
LH: loop header
LB: loop body
LE: loop exit
PB: predicated region body
PF: predicated region fallthrough
CT: control target
= control target key end

     0   :  { %vm113_vm0 = vcmask 1040384   ;;  %v913_v3 = vmov 0   ;;  %s1143_s0 = inlined_call_operand.vmem [shape: bf16[17,256], index: 0, kind: input, shape index: {}]   ;;  %s1144_s1 = inlined_call_operand.vmem [shape: bf16[96,17], index: 1, kind: input, shape index: {}]   ;;  %s1145_s2 = inlined_call_operand.vmem [shape: bf16[96,17], index: 2, kind: input, shape index: {}]   ;;  %s1146_s3 = inlined_call_operand.vmem [shape: bf16[64,96], index: 3, kind: input, shape index: {}]   ;;  %s1147_s4 = inlined_call_operand.vmem [shape: f32[64,1], index: 4, kind: input, shape index: {}]   ;;  %s1148_s5 = inlined_call_operand.vmem [shape: bf16[24,32], index: 5, kind: input, shape index: {}]   ;;  %s1149_s6 = inlined_call_operand.vmem [shape: f32[24,1], index: 6, kind: input, shape index: {}]   ;;  %s1150_s7 = inlined_call_operand.vmem [shape: bf16[20,24], index: 7, kind: input, shape index: {}]   ;;  %s1151_s8 = inlined_call_operand.vmem [shape: f32[20,1], index: 8, kind: input, shape index: {}]   ;;  %s1152_s9 = inlined_call_operand.hbm [shape: f32[20,128], index: 9, kind: output, shape index: {}]  }
   0x1   :  { %v36_v0 = vld [vmem:[%s1143_s0 + $0x10] sm:$0x11]  ;;  %885 = vset.pattern.permute.xlu1 %v913_v3  ;;  %884 = vset.pattern.permute.xlu0 %v913_v3  ;;  %v115_v4 = vsel %vm113_vm0, 65535, %v913_v3  ;;  %v766_v7 = vld [vmem:[%s1143_s0] sm:$0xf] }
   0x2   :  { %v86_v1 = vunpack.c.l.b16 %v36_v0  ;;  %v87_v2 = vunpack.c.h.b16 %v36_v0  ;;  %886 = vset.pattern.permute.xlu2 %v913_v3 }
   0x4   :  { %v90_v5 = vpack.c.b16 %v86_v1, %v86_v1  ;;  %v91_v6 = vpack.c.b16 %v87_v2, %v87_v2 }
   0x5   :  { %14 = vsyncpa [#allocation3], 0  ;;  %v857_v8 = vld [vmem:[%s1143_s0 + $0x4] sm:$0xf0]  ;;  %v856_v9 = vld [vmem:[%s1143_s0 + $0x4] sm:$0xf] }
   0x6   :  { %v768_v10 = vld [vmem:[%s1143_s0 + $0x8] sm:$0xf0]  ;;  %v117_v11 = vand.u32 %v115_v4, %v90_v5  ;;  %v120_v12 = vand.u32 %v115_v4, %v91_v6  ;;  %v767_v13 = vor.u32 %v857_v8, %v766_v7  ;;  %vm94_vm1 = vcmask 138240   ;;  %v858_v16 = vld [vmem:[%s1144_s1] sm:$0xff]  ;;  %v860_v20 = vld [vmem:[%s1144_s1 + $0x10] sm:$0xff]  ;;  %s914_s12 = smov [#allocation2]  }
   0x7   :  { %v771_v14 = vor.u32 %v856_v9, %v768_v10  ;;  %v863_v15 = vld [vmem:[%s1144_s1 + $0x28] sm:$0xff]  ;;  %v864_v17 = vld [vmem:[%s1145_s2] sm:$0xff]  ;;  %v866_v21 = vld [vmem:[%s1145_s2 + $0x10] sm:$0xff]  ;;  %vm450_vm2 = vcmask 785408   ;;  %vm628_vm3 = vcmask 261120   ;;  %vm697_vm4 = vcmask 1043456  }
   0x8   :  { %876 = vmatpush.bf16.msra.mxu2 %v117_v11  ;;  %878 = vmatpush.bf16.msra.mxu3 %v120_v12  ;;  %v859_v18 = vld [vmem:[%s1144_s1 + $0x8] sm:$0xff]  ;;  %v861_v22 = vld [vmem:[%s1144_s1 + $0x18] sm:$0xff]  ;;  %v862_v24 = vld [vmem:[%s1144_s1 + $0x20] sm:$0xff]  ;;  %vm690_vm5 = vcmask 195584   ;;  %s726_s13 = sshll.u32 %s914_s12, 4  ;;  %s728_s16 = sshll.u32 %s1152_s9, 4  ;;  %s727_s13 = int_to_ptr.vmem [resolvable:$true] %s726_s13  ;;  %s729_s16 = int_to_ptr.hbm [resolvable:$true] %s728_s16 }
   0x9   :  { %128 = vmatpush.bf16.msra.mxu0 %v117_v11  ;;  %167 = vmatpush.bf16.msra.mxu1 %v120_v12  ;;  %v865_v19 = vld [vmem:[%s1145_s2 + $0x8] sm:$0xff]  ;;  %v867_v23 = vld [vmem:[%s1145_s2 + $0x18] sm:$0xff]  ;;  %v868_v25 = vld [vmem:[%s1145_s2 + $0x20] sm:$0xff]  ;;  %s916_s17 = smov 8  }
   0xa   :  { %v869_v26 = vld [vmem:[%s1145_s2 + $0x28] sm:$0xff] }
   0xc   :  { %877 = vmatpush.bf16.msra.mxu2 %v767_v13  ;;  %879 = vmatpush.bf16.msra.mxu3 %v771_v14 }
   0xd   :  { %129 = vmatpush.bf16.msra.mxu0 %v767_v13  ;;  %168 = vmatpush.bf16.msra.mxu1 %v771_v14 }
   0xf   :  { %777 = vmatmul.msk.bf16.vlgmr.msra.gmra.mxu2 %vm94_vm1, %v863_v15  ;;  %783 = vmatmul.msk.bf16.vlgmr.msra.gmra.mxu3 %vm94_vm1, %v863_v15 }
  0x10   :  { %266 = vmatpush.bf16.msrb.mxu2 %v117_v11  ;;  %305 = vmatpush.bf16.msrb.mxu3 %v120_v12 }
  0x11   :  { %772 = vmatmul.msk.bf16.vlgmr.msra.gmra.mxu0 %vm94_vm1, %v858_v16  ;;  %778 = vmatmul.msk.bf16.vlgmr.msra.gmra.mxu1 %vm94_vm1, %v858_v16 }
  0x14   :  { %267 = vmatpush.bf16.msrb.mxu2 %v767_v13  ;;  %306 = vmatpush.bf16.msrb.mxu3 %v771_v14 }
  0x1f   :  { %808 = vmatmul.msk.bf16.vlgmr.msrb.gmra.mxu2 %vm94_vm1, %v864_v17  ;;  %814 = vmatmul.msk.bf16.vlgmr.msrb.gmra.mxu3 %vm94_vm1, %v864_v17 }
  0x21   :  { %773 = vmatmul.msk.bf16.gmra.mxu0 %vm94_vm1, %v859_v18  ;;  %779 = vmatmul.msk.bf16.gmra.mxu1 %vm94_vm1, %v859_v18 }
  0x2f   :  { %809 = vmatmul.msk.bf16.gmra.mxu2 %vm94_vm1, %v865_v19  ;;  %815 = vmatmul.msk.bf16.gmra.mxu3 %vm94_vm1, %v865_v19 }
  0x31   :  { %774 = vmatmul.msk.bf16.gmra.mxu0 %vm94_vm1, %v860_v20  ;;  %780 = vmatmul.msk.bf16.gmra.mxu1 %vm94_vm1, %v860_v20 }
  0x3f   :  { %810 = vmatmul.msk.bf16.gmra.mxu2 %vm94_vm1, %v866_v21  ;;  %816 = vmatmul.msk.bf16.gmra.mxu3 %vm94_vm1, %v866_v21 }
  0x41   :  { %775 = vmatmul.msk.bf16.gmra.mxu0 %vm94_vm1, %v861_v22  ;;  %781 = vmatmul.msk.bf16.gmra.mxu1 %vm94_vm1, %v861_v22 }
  0x4f   :  { %811 = vmatmul.msk.bf16.gmra.mxu2 %vm94_vm1, %v867_v23  ;;  %817 = vmatmul.msk.bf16.gmra.mxu3 %vm94_vm1, %v867_v23 }
  0x51   :  { %776 = vmatmul.msk.bf16.gmra.mxu0 %vm94_vm1, %v862_v24  ;;  %782 = vmatmul.msk.bf16.gmra.mxu1 %vm94_vm1, %v862_v24 }
  0x5f   :  { %812 = vmatmul.msk.bf16.gmra.mxu2 %vm94_vm1, %v868_v25  ;;  %818 = vmatmul.msk.bf16.gmra.mxu3 %vm94_vm1, %v868_v25 }
  0x6f   :  { %813 = vmatmul.msk.bf16.gmra.mxu2 %vm94_vm1, %v869_v26  ;;  %819 = vmatmul.msk.bf16.gmra.mxu3 %vm94_vm1, %v869_v26 }
  0x8e   :  { %v131_v29 = vpop.f32.mrf.mxu0  ;;  %v170_v30 = vpop.f32.mrf.mxu1 }
  0x92   :  { %v1042_v27 = vpop.f32.mrf.mxu2  ;;  %v1044_v28 = vpop.f32.mrf.mxu3 }
  0x96   :  { %v133_v37 = vpop.f32.mrf.mxu0  ;;  %v172_v38 = vpop.f32.mrf.mxu1 }
  0x9a   :  { %v1046_v31 = vpop.f32.mrf.mxu2  ;;  %v1048_v32 = vpop.f32.mrf.mxu3 }
  0x9e   :  { %v136_v47 = vpop.f32.mrf.mxu0  ;;  %v175_v48 = vpop.f32.mrf.mxu1 }
  0xa2   :  { %v269_v33 = vpop.f32.mrf.mxu2  ;;  %v308_v34 = vpop.f32.mrf.mxu3 }
  0xa3   :  { %v338_v35 = vmax.f32 %v131_v29, %v269_v33  ;;  %v339_v36 = vmax.f32 %v170_v30, %v308_v34 }
  0xa5   :  { %v362_v41 = vmul.f32 0.01, %v338_v35  ;;  %v363_v42 = vmul.f32 0.01, %v339_v36 }
  0xa6   :  { %v138_v59 = vpop.f32.mrf.mxu0  ;;  %v177_v60 = vpop.f32.mrf.mxu1 }
  0xa7   :  { %v386_v49 = vmax.f32 %v338_v35, %v362_v41  ;;  %v387_v50 = vmax.f32 %v339_v36, %v363_v42 }
  0xaa   :  { %v271_v39 = vpop.f32.mrf.mxu2  ;;  %v310_v40 = vpop.f32.mrf.mxu3 }
  0xab   :  { %v340_v43 = vmax.f32 %v133_v37, %v271_v39  ;;  %v341_v44 = vmax.f32 %v172_v38, %v310_v40 }
  0xad   :  { %v364_v45 = vmul.f32 0.01, %v340_v43  ;;  %v365_v46 = vmul.f32 0.01, %v341_v44 }
  0xae   :  { %v141_v13 = vpop.f32.mrf.mxu0  ;;  %v180_v14 = vpop.f32.mrf.mxu1 }
  0xaf   :  { %v388_v51 = vmax.f32 %v340_v43, %v364_v45  ;;  %v389_v52 = vmax.f32 %v341_v44, %v365_v46 }
  0xb1   :  { %v1050_v53 = vpack.c.bf16 %v388_v51, %v386_v49  ;;  %v1052_v54 = vpack.c.bf16 %v389_v52, %v387_v50 }
  0xb2   :  { %v274_v55 = vpop.f32.mrf.mxu2  ;;  %v313_v56 = vpop.f32.mrf.mxu3 }
  0xb3   :  { %v342_v57 = vmax.f32 %v136_v47, %v274_v55  ;;  %v343_v58 = vmax.f32 %v175_v48, %v313_v56 }
  0xb5   :  { %v366_v63 = vmul.f32 0.01, %v342_v57  ;;  %v367_v0 = vmul.f32 0.01, %v343_v58 }
  0xb6   :  { %v143_v17 = vpop.f32.mrf.mxu0  ;;  %v182_v18 = vpop.f32.mrf.mxu1 }
  0xb7   :  { %v390_v5 = vmax.f32 %v342_v57, %v366_v63  ;;  %v391_v6 = vmax.f32 %v343_v58, %v367_v0 }
  0xba   :  { %v276_v61 = vpop.f32.mrf.mxu2  ;;  %v315_v62 = vpop.f32.mrf.mxu3 }
  0xbb   :  { %v344_v1 = vmax.f32 %v138_v59, %v276_v61  ;;  %v345_v2 = vmax.f32 %v177_v60, %v315_v62 }
  0xbd   :  { %v368_v3 = vmul.f32 0.01, %v344_v1  ;;  %v369_v4 = vmul.f32 0.01, %v345_v2 }
  0xbe   :  { %v146_v21 = vpop.f32.mrf.mxu0  ;;  %v185_v22 = vpop.f32.mrf.mxu1 }
  0xbf   :  { %v392_v7 = vmax.f32 %v344_v1, %v368_v3  ;;  %v393_v8 = vmax.f32 %v345_v2, %v369_v4 }
  0xc1   :  { %v1054_v9 = vpack.c.bf16 %v392_v7, %v390_v5  ;;  %v1056_v10 = vpack.c.bf16 %v393_v8, %v391_v6 }
  0xc2   :  { %v279_v11 = vpop.f32.mrf.mxu2  ;;  %v318_v12 = vpop.f32.mrf.mxu3 }
  0xc6   :  { %v148_v25 = vpop.f32.mrf.mxu0  ;;  %v187_v26 = vpop.f32.mrf.mxu1 }
  0xca   :  { %v281_v15 = vpop.f32.mrf.mxu2  ;;  %v320_v16 = vpop.f32.mrf.mxu3 }
  0xcb   :  { %v348_v3 = vmax.f32 %v143_v17, %v281_v15  ;;  %v349_v4 = vmax.f32 %v182_v18, %v320_v16 }
  0xce   :  { %v151_v35 = vpop.f32.mrf.mxu0  ;;  %v190_v36 = vpop.f32.mrf.mxu1 }
  0xd2   :  { %v284_v19 = vpop.f32.mrf.mxu2  ;;  %v323_v20 = vpop.f32.mrf.mxu3 }
  0xd3   :  { %v350_v60 = vmax.f32 %v146_v21, %v284_v19  ;;  %v372_v21 = vmul.f32 0.01, %v348_v3 }
  0xd6   :  { %v153_v39 = vpop.f32.mrf.mxu0  ;;  %v192_v40 = vpop.f32.mrf.mxu1 }
  0xda   :  { %v286_v23 = vpop.f32.mrf.mxu2  ;;  %v325_v24 = vpop.f32.mrf.mxu3 }
  0xdb   :  { %v352_v55 = vmax.f32 %v148_v25, %v286_v23  ;;  %v353_v56 = vmax.f32 %v187_v26, %v325_v24  ;;  %v346_v23 = vmax.f32 %v141_v13, %v279_v11  ;;  %v347_v24 = vmax.f32 %v180_v14, %v318_v12 }
  0xdc   :  { %v374_v25 = vmul.f32 0.01, %v350_v60  ;;  %v396_v11 = vmax.f32 %v348_v3, %v372_v21 }
  0xdd   :  { %v376_v5 = vmul.f32 0.01, %v352_v55  ;;  %v370_v17 = vmul.f32 0.01, %v346_v23  ;;  %v371_v18 = vmul.f32 0.01, %v347_v24 }
  0xe2   :  { %v289_v29 = vpop.f32.mrf.mxu2  ;;  %v328_v30 = vpop.f32.mrf.mxu3 }
  0xe3   :  { %v354_v45 = vmax.f32 %v151_v35, %v289_v29  ;;  %v355_v46 = vmax.f32 %v190_v36, %v328_v30  ;;  %v400_v29 = vmax.f32 %v352_v55, %v376_v5  ;;  %v535_v35 = vld [vmem:[%s1147_s4 + $0x30] sm:$0xff] }
  0xe4   :  { %v531_v36 = vld [vmem:[%s1147_s4 + $0x10] sm:$0xff]  ;;  %569 = vperm.xlu1 %885, %v535_v35  }
  0xe5   :  { %v378_v61 = vmul.f32 0.01, %v354_v45  ;;  %v379_v62 = vmul.f32 0.01, %v355_v46  ;;  %549 = vperm.xlu0 %884, %v531_v36  }
  0xe7   :  { %v402_v19 = vmax.f32 %v354_v45, %v378_v61  ;;  %v603_v45 = vld [vmem:[%s1149_s6 + $0x8] sm:$0xff] }
  0xea   :  { %v291_v33 = vpop.f32.mrf.mxu2  ;;  %v330_v34 = vpop.f32.mrf.mxu3 }
  0xeb   :  { %v356_v43 = vmax.f32 %v153_v39, %v291_v33  ;;  %v357_v44 = vmax.f32 %v192_v40, %v330_v34  ;;  %v398_v33 = vmax.f32 %v350_v60, %v374_v25 }
  0xed   :  { %v380_v57 = vmul.f32 0.01, %v356_v43  ;;  %v381_v58 = vmul.f32 0.01, %v357_v44  ;;  %v424_v13 = vpack.c.bf16 %v400_v29, %v398_v33 }
  0xef   :  { %v404_v6 = vmax.f32 %v356_v43, %v380_v57  ;;  %v530_v43 = vld [vmem:[%s1147_s4 + $0x8] sm:$0xff] }
  0xf1   :  { %v426_v15 = vpack.c.bf16 %v404_v6, %v402_v19 }
  0xf2   :  { %v294_v37 = vpop.f32.mrf.mxu2  ;;  %v333_v38 = vpop.f32.mrf.mxu3 }
  0xf3   :  { %v358_v41 = vmax.f32 %v1042_v27, %v294_v37  ;;  %v359_v42 = vmax.f32 %v1044_v28, %v333_v38  ;;  %v351_v28 = vmax.f32 %v185_v22, %v323_v20  ;;  %v403_v20 = vmax.f32 %v355_v46, %v379_v62  ;;  %v602_v46 = vld [vmem:[%s1149_s6] sm:$0xff] }
  0xf4   :  { %v373_v22 = vmul.f32 0.01, %v349_v4  ;;  %v394_v37 = vmax.f32 %v346_v23, %v370_v17  ;;  %v395_v38 = vmax.f32 %v347_v24, %v371_v18 }
  0xf5   :  { %v382_v49 = vmul.f32 0.01, %v358_v41  ;;  %v383_v50 = vmul.f32 0.01, %v359_v42  ;;  %v375_v26 = vmul.f32 0.01, %v351_v28 }
  0xf6   :  { %v397_v12 = vmax.f32 %v349_v4, %v373_v22  ;;  %v422_v39 = vpack.c.bf16 %v396_v11, %v394_v37 }
  0xf7   :  { %v406_v63 = vmax.f32 %v358_v41, %v382_v49  ;;  %v407_v0 = vmax.f32 %v359_v42, %v383_v50  ;;  %v399_v34 = vmax.f32 %v351_v28, %v375_v26  ;;  %v870_v41 = vld [vmem:[%s1146_s3] sm:$0xff]  ;;  %v536_v42 = vld [vmem:[%s1147_s4 + $0x38] sm:$0xff]  ;;  %v665_v49 = vld [vmem:[%s1151_s8 + $0x8] sm:$0xff] }
  0xf8   :  { %v423_v40 = vpack.c.bf16 %v397_v12, %v395_v38  ;;  %574 = vperm.xlu1 %885, %v536_v42   ;;  %v664_v50 = vld [vmem:[%s1151_s8] sm:$0xff] }
  0xfa   :  { %v296_v47 = vpop.f32.mrf.mxu2  ;;  %v335_v48 = vpop.f32.mrf.mxu3 }
  0xfb   :  { %v360_v51 = vmax.f32 %v1046_v31, %v296_v47  ;;  %v361_v52 = vmax.f32 %v1048_v32, %v335_v48  ;;  %v377_v31 = vmul.f32 0.01, %v353_v56  ;;  %v405_v32 = vmax.f32 %v357_v44, %v381_v58  ;;  %v871_v44 = vld [vmem:[%s1146_s3 + $0x8] sm:$0xff]  ;;  %v604_v47 = vld [vmem:[%s1149_s6 + $0x10] sm:$0xff] }
  0xfc   :  { %v666_v48 = vld [vmem:[%s1151_s8 + $0x10] sm:$0xf] }
  0xfd   :  { %v384_v59 = vmul.f32 0.01, %v360_v51  ;;  %v385_v27 = vmul.f32 0.01, %v361_v52  ;;  %v401_v30 = vmax.f32 %v353_v56, %v377_v31  ;;  %v427_v16 = vpack.c.bf16 %v405_v32, %v403_v20 }
  0xff   :  { %v408_v1 = vmax.f32 %v360_v51, %v384_v59  ;;  %v409_v2 = vmax.f32 %v361_v52, %v385_v27  ;;  %v425_v14 = vpack.c.bf16 %v401_v30, %v399_v34  ;;  %v872_v51 = vld [vmem:[%s1146_s3 + $0x10] sm:$0xff]  ;;  %v873_v52 = vld [vmem:[%s1146_s3 + $0x18] sm:$0xff] }
 0x101   :  { %v428_v7 = vpack.c.bf16 %v408_v1, %v406_v63  ;;  %v429_v8 = vpack.c.bf16 %v409_v2, %v407_v0 }
 0x103   :  { %465 = vmatpush.bf16.msrb.mxu0 %v428_v7  ;;  %494 = vmatpush.bf16.msrb.mxu1 %v429_v8 }
 0x107   :  { %466 = vmatpush.bf16.msrb.mxu0 %v426_v15  ;;  %495 = vmatpush.bf16.msrb.mxu1 %v427_v16 }
 0x10b   :  { %467 = vmatpush.bf16.msrb.mxu0 %v424_v13  ;;  %496 = vmatpush.bf16.msrb.mxu1 %v425_v14 }
 0x10f   :  { %468 = vmatpush.bf16.msrb.mxu0 %v422_v39  ;;  %497 = vmatpush.bf16.msrb.mxu1 %v423_v40 }
 0x113   :  { %469 = vmatpush.bf16.msrb.mxu0 %v1054_v9  ;;  %498 = vmatpush.bf16.msrb.mxu1 %v1056_v10  ;;  %v532_v9 = vld [vmem:[%s1147_s4 + $0x18] sm:$0xff]  ;;  %v529_v10 = vld [vmem:[%s1147_s4] sm:$0xff] }
 0x114   :  { %554 = vperm.xlu0 %884, %v532_v9   ;;  %539 = vperm.xlu2 %886, %v529_v10  }
 0x117   :  { %470 = vmatpush.bf16.msrb.mxu0 %v1050_v53  ;;  %499 = vmatpush.bf16.msrb.mxu1 %v1052_v54  ;;  %v534_v53 = vld [vmem:[%s1147_s4 + $0x28] sm:$0xff]  ;;  %v533_v54 = vld [vmem:[%s1147_s4 + $0x20] sm:$0xff] }
 0x118   :  { %564 = vperm.xlu1 %885, %v534_v53  }
 0x11a   :  { %836 = vmatmul.msk.bf16.vlgmr.msrb.gmra.mxu0 %vm450_vm2, %v870_v41  ;;  %840 = vmatmul.msk.bf16.vlgmr.msrb.gmra.mxu1 %vm450_vm2, %v870_v41 }
 0x11c   :  { %559 = vperm.xlu0 %884, %v533_v54   ;;  %544 = vperm.xlu2 %886, %v530_v43   ;;  %v874_v43 = vld [vmem:[%s1148_s5] sm:$0xff] }
 0x120   :  { %612 = vperm.xlu1 %885, %v603_v45  }
 0x124   :  { %607 = vperm.xlu0 %884, %v602_v46   ;;  %617 = vperm.xlu2 %886, %v604_v47  }
 0x128   :  { %679 = vperm.xlu1 %885, %v666_v48  }
 0x12a   :  { %837 = vmatmul.msk.bf16.gmra.mxu0 %vm450_vm2, %v871_v44  ;;  %841 = vmatmul.msk.bf16.gmra.mxu1 %vm450_vm2, %v871_v44  ;;  %v599_v44 = vld [vmem:[%s1148_s5 + $0x8] sm:$0xf] }
 0x12b   :  { %v625_v45 = vunpack.c.l.b16 %v599_v44 }
 0x12c   :  { %674 = vperm.xlu0 %884, %v665_v49   ;;  %669 = vperm.xlu2 %886, %v664_v50  }
 0x12d   :  { %v627_v46 = vpack.c.b16 %v625_v45, %v625_v45 }
 0x13a   :  { %838 = vmatmul.msk.bf16.gmra.mxu0 %vm450_vm2, %v872_v51  ;;  %842 = vmatmul.msk.bf16.gmra.mxu1 %vm450_vm2, %v872_v51 }
 0x14a   :  { %839 = vmatmul.msk.bf16.gmra.mxu0 %vm450_vm2, %v873_v52  ;;  %843 = vmatmul.msk.bf16.gmra.mxu1 %vm450_vm2, %v873_v52 }
 0x156   :  { %v570_v63 = vpop.permute.xlu1 %569 }
 0x157   :  { %v550_v0 = vpop.permute.xlu0 %549 }
 0x16a   :  { %v575_v4 = vpop.permute.xlu1 %574 }
 0x16e   :  { %v540_v3 = vpop.permute.xlu2 %539 }
 0x176   :  { %v545_v26 = vpop.permute.xlu2 %544 }
 0x17e   :  { %v618_v50 = vpop.permute.xlu2 %617 }
 0x186   :  { %v555_v5 = vpop.permute.xlu0 %554 }
 0x18a   :  { %v565_v19 = vpop.permute.xlu1 %564 }
 0x18e   :  { %v560_v29 = vpop.permute.xlu0 %559 }
 0x192   :  { %v613_v49 = vpop.permute.xlu1 %612 }
 0x197   :  { %v472_v55 = vpop.f32.mrf.mxu0  ;;  %v501_v56 = vpop.f32.mrf.mxu1 }
 0x198   :  { %v521_v20 = vmax.f32 %v472_v55, %v501_v56  ;;  %v608_v55 = vpop.permute.xlu0 %607 }
 0x19a   :  { %v577_v11 = vadd.f32 %v540_v3, %v521_v20  ;;  %v661_v3 = vld [vmem:[%s1150_s7 + $0x8] sm:$0x3] }
 0x19f   :  { %v474_v57 = vpop.f32.mrf.mxu0  ;;  %v503_v58 = vpop.f32.mrf.mxu1 }
 0x1a0   :  { %v522_v23 = vmax.f32 %v474_v57, %v503_v58 }
 0x1a2   :  { %v578_v17 = vadd.f32 %v545_v26, %v522_v23 }
 0x1a7   :  { %v477_v59 = vpop.f32.mrf.mxu0  ;;  %v506_v27 = vpop.f32.mrf.mxu1 }
 0x1a8   :  { %v523_v7 = vmax.f32 %v477_v59, %v506_v27 }
 0x1aa   :  { %v579_v21 = vadd.f32 %v550_v0, %v523_v7  ;;  %v675_v7 = vpop.permute.xlu0 %674 }
 0x1af   :  { %v479_v60 = vpop.f32.mrf.mxu0  ;;  %v508_v28 = vpop.f32.mrf.mxu1 }
 0x1b0   :  { %v524_v22 = vmax.f32 %v479_v60, %v508_v28 }
 0x1b2   :  { %v580_v12 = vadd.f32 %v555_v5, %v524_v22 }
 0x1b7   :  { %v482_v61 = vpop.f32.mrf.mxu0  ;;  %v511_v62 = vpop.f32.mrf.mxu1 }
 0x1b8   :  { %v525_v24 = vmax.f32 %v482_v61, %v511_v62 }
 0x1ba   :  { %v581_v18 = vadd.f32 %v560_v29, %v525_v24  ;;  %v680_v24 = vpop.permute.xlu1 %679 }
 0x1bc   :  { %v585_v35 = vmax.f32 %v577_v11, %v581_v18 }
 0x1be   :  { %v589_v40 = vmul.f32 0.01, %v585_v35 }
 0x1bf   :  { %v484_v1 = vpop.f32.mrf.mxu0  ;;  %v513_v2 = vpop.f32.mrf.mxu1 }
 0x1c0   :  { %v526_v8 = vmax.f32 %v484_v1, %v513_v2  ;;  %v593_v53 = vmax.f32 %v585_v35, %v589_v40  ;;  %v875_v2 = vld [vmem:[%s1150_s7] sm:$0xff]  ;;  %s915_s7 = smov 128  }
 0x1c2   :  { %v582_v30 = vadd.f32 %v565_v19, %v526_v8 }
 0x1c4   :  { %v586_v13 = vmax.f32 %v578_v17, %v582_v30 }
 0x1c6   :  { %v590_v38 = vmul.f32 0.01, %v586_v13 }
 0x1c7   :  { %v487_v31 = vpop.f32.mrf.mxu0  ;;  %v516_v6 = vpop.f32.mrf.mxu1 }
 0x1c8   :  { %v527_v32 = vmax.f32 %v487_v31, %v516_v6  ;;  %v594_v10 = vmax.f32 %v586_v13, %v590_v38  ;;  %v670_v31 = vpop.permute.xlu2 %669 }
 0x1ca   :  { %v583_v25 = vadd.f32 %v570_v63, %v527_v32  ;;  %v600_v54 = vpack.c.bf16 %v594_v10, %v593_v53 }
 0x1cc   :  { %v587_v33 = vmax.f32 %v579_v21, %v583_v25 }
 0x1ce   :  { %v591_v36 = vmul.f32 0.01, %v587_v33 }
 0x1cf   :  { %v489_v15 = vpop.f32.mrf.mxu0  ;;  %v518_v16 = vpop.f32.mrf.mxu1 }
 0x1d0   :  { %v528_v34 = vmax.f32 %v489_v15, %v518_v16  ;;  %v595_v41 = vmax.f32 %v587_v33, %v591_v36 }
 0x1d2   :  { %v584_v14 = vadd.f32 %v575_v4, %v528_v34  ;;  %v687_v4 = vunpack.c.l.b16 %v661_v3 }
 0x1d4   :  { %v588_v37 = vmax.f32 %v580_v12, %v584_v14  ;;  %v689_v5 = vpack.c.b16 %v687_v4, %v687_v4 }
 0x1d6   :  { %v592_v39 = vmul.f32 0.01, %v588_v37 }
 0x1d8   :  { %v596_v42 = vmax.f32 %v588_v37, %v592_v39 }
 0x1da   :  { %v601_v9 = vpack.c.bf16 %v596_v42, %v595_v41 }
 0x1dc   :  { %641 = vmatpush.bf16.msra.mxu2 %v601_v9 }
 0x1e0   :  { %642 = vmatpush.bf16.msra.mxu2 %v600_v54 }
 0x1e3   :  { %848 = vmatmul.msk.bf16.vlgmr.msra.gmra.mxu2 %vm628_vm3, %v874_v43 }
 0x1f3   :  { %849 = vmatmul.msk.bf16.gmra.mxu2 %vm628_vm3, %v627_v46 }
 0x266   :  { %v644_v47 = vpop.f32.mrf.mxu2 }
 0x267   :  { %v645_v57 = vadd.f32 %v644_v47, %v608_v55 }
 0x269   :  { %v653_v60 = vmul.f32 0.01, %v645_v57 }
 0x26b   :  { %v656_v0 = vmax.f32 %v645_v57, %v653_v60 }
 0x26e   :  { %v646_v48 = vpop.f32.mrf.mxu2 }
 0x26f   :  { %v647_v51 = vadd.f32 %v646_v48, %v613_v49 }
 0x271   :  { %v654_v59 = vmul.f32 0.01, %v647_v51 }
 0x273   :  { %v657_v61 = vmax.f32 %v647_v51, %v654_v59 }
 0x275   :  { %v662_v1 = vpack.c.bf16 %v657_v61, %v656_v0 }
 0x276   :  { %v649_v52 = vpop.f32.mrf.mxu2 }
 0x277   :  { %v650_v56 = vadd.f32 %v649_v52, %v618_v50 }
 0x279   :  { %v655_v58 = vmul.f32 0.01, %v650_v56 }
 0x27b   :  { %v658_v27 = vmax.f32 %v650_v56, %v655_v58 }
 0x27d   :  { %v663_v28 = vpack.c.bf16 %v658_v27, %v658_v27 }
 0x27e   :  { %v651_v62 = vpop.f32.mrf.mxu2 }
 0x27f   :  { %v699_v63 = vsel %vm697_vm4, %v663_v28, 0 }
 0x280   :  { %707 = vmatpush.bf16.msra.mxu3 %v699_v63 }
 0x284   :  { %708 = vmatpush.bf16.msra.mxu3 %v662_v1 }
 0x287   :  { %854 = vmatmul.msk.bf16.vlgmr.msra.gmra.mxu3 %vm690_vm5, %v875_v2 }
 0x297   :  { %855 = vmatmul.msk.bf16.gmra.mxu3 %vm690_vm5, %v689_v5 }
 0x30a   :  { %v710_v6 = vpop.f32.mrf.mxu3 }
 0x30b   :  { %v711_v32 = vadd.f32 %v710_v6, %v670_v31 }
 0x30d   :  { %719 = vst [vmem:[#allocation2] sm:$0xff] %v711_v32 }
 0x312   :  { %v712_v8 = vpop.f32.mrf.mxu3 }
 0x313   :  { %v713_v23 = vadd.f32 %v712_v8, %v675_v7 }
 0x315   :  { %720 = vst [vmem:[#allocation2 + $0x8] sm:$0xff] %v713_v23 }
 0x31a   :  { %v715_v25 = vpop.f32.mrf.mxu3 }
 0x31b   :  { %v716_v26 = vadd.f32 %v715_v25, %v680_v24 }
 0x31d   :  { %721 = vst [vmem:[#allocation2 + $0x10] sm:$0xf] %v716_v26 }
 0x31e   :  { %734 = dma.vmem_to_hbm [thread:$0]  %s727_s13, 384, %s729_s16, [#allocation3], %s915_s7, %s915_s7, %s916_s17  }
 0x322   :  { %v717_v19 = vpop.f32.mrf.mxu3 }
 0x323   :  { %911 = dma.done.wait [#allocation3], 384  }
 0x324   :  { %912 = vsyncadd [#allocation3], 4294966912 }
 0x325   :  { %739 = vsyncpa [#allocation3], 1 }

</bundles_post_ra>
